<compile_context>
chip_gen: v7x
topology: tpu7x:2x2x1
jax: 0.10.0
libtpu: 0.0.40
codegen_flags: <defaults>
</compile_context>

<pallas_src>
import functools

import jax
import jax.numpy as jnp
from jax.experimental import pallas as pl
from jax.experimental.pallas import tpu as pltpu


def _round_up(x, m):
    return ((x + m - 1) // m) * m


def _vae_kernel(
    x_ref, eps_ref,
    w_e1_ref, w_e2_ref, w_muvar_ref, w_dfc_ref, w_d1_ref, w_d2_ref,
    bias_ref,
    x_out_ref, lat_ref,
    *, dims, bias_offsets,
):
    """Fused VAE forward for one batch tile:
    encoder MLP -> fused fc_mu|fc_var -> reparameterize -> decoder_fc ->
    decoder MLP (+sigmoid). Matmuls run bf16 on the MXU with f32 accumulation;
    all elementwise / transcendental math stays f32 (VPU/EUP)."""
    D_in, H, F = dims
    o_e1, o_e2, o_muvar, o_dfc, o_d1, o_d2 = bias_offsets

    def bias(off, width):
        return bias_ref[:, off:off + width]            # [1, width] f32, broadcasts over rows

    bf16 = jnp.bfloat16
    x = x_ref[...].astype(bf16)                        # [TB, D_in]

    # ----- encoder (stand-in for RA_Encoder) -----
    h = jnp.dot(x, w_e1_ref[...], preferred_element_type=jnp.float32)
    h = jnp.maximum(h + bias(o_e1, H), 0.0)
    z_enc = jnp.dot(h.astype(bf16), w_e2_ref[...], preferred_element_type=jnp.float32)
    z_enc = jnp.maximum(z_enc + bias(o_e2, F), 0.0)    # [TB, F]

    # ----- fused fc_mu | fc_var (single MXU pass) -----
    muvar = jnp.dot(z_enc.astype(bf16), w_muvar_ref[...],
                    preferred_element_type=jnp.float32) + bias(o_muvar, 2 * F)
    mu = muvar[:, :F]
    log_var = muvar[:, F:]

    # ----- reparameterize: z = mu + eps * exp(0.5 * log_var)  (f32) -----
    std = jnp.exp(0.5 * log_var)
    z = mu + eps_ref[...] * std                        # [TB, F]

    # ----- decoder_fc -----
    d = jnp.dot(z.astype(bf16), w_dfc_ref[...],
                preferred_element_type=jnp.float32) + bias(o_dfc, F)

    # ----- decoder (stand-in for RA_Decoder, sigmoid output_activation) -----
    d = jnp.dot(d.astype(bf16), w_d1_ref[...], preferred_element_type=jnp.float32)
    d = jnp.maximum(d + bias(o_d1, H), 0.0)
    x_rec = jnp.dot(d.astype(bf16), w_d2_ref[...], preferred_element_type=jnp.float32)
    x_rec = jax.nn.sigmoid(x_rec + bias(o_d2, D_in))   # [TB, D_in]

    x_out_ref[...] = x_rec

    # ----- lane-dense latent slab: [ z | mu | log_var | zero-pad ] -----
    lat_width = lat_ref.shape[-1]
    lat = jnp.concatenate([z, mu, log_var], axis=-1)   # [TB, 3F]
    pad = lat_width - 3 * F
    if pad:
        lat = jnp.concatenate(
            [lat, jnp.zeros((lat.shape[0], pad), jnp.float32)], axis=-1)
    lat_ref[...] = lat


def vae_forward(x, eps, params):
    """x: [B, C, I, S] float32, eps: [B, fc_dim] float32 (reparam noise).
    Returns (x_out [B,C,I,S], z, mu, log_var)."""
    B, C, I, S = x.shape
    D_in = C * I * S
    F = params["w_mu"].shape[0]
    H = params["w_e1"].shape[1]

    x_flat = x.reshape(B, D_in).astype(jnp.float32)

    # --- batch tiling: fill MXU M-dimension, pipeline + megacore over batch ---
    TILE_B = min(128, _round_up(B, 8))
    B_pad = _round_up(B, TILE_B)
    if B_pad != B:
        x_flat = jnp.pad(x_flat, ((0, B_pad - B), (0, 0)))
        eps_p = jnp.pad(eps, ((0, B_pad - B), (0, 0)))
    else:
        eps_p = eps
    grid = (B_pad // TILE_B,)

    # --- bf16 weights for the MXU; fuse mu|var into one matrix ---
    bf16 = jnp.bfloat16
    w_e1 = params["w_e1"].astype(bf16)
    w_e2 = params["w_e2"].astype(bf16)
    w_muvar = jnp.concatenate([params["w_mu"], params["w_var"]], axis=1).astype(bf16)
    w_dfc = params["w_dfc"].astype(bf16)
    w_d1 = params["w_d1"].astype(bf16)
    w_d2 = params["w_d2"].astype(bf16)

    # --- pack all biases into one f32 slab (128-aligned segments, 1 DMA) ---
    segments = [
        params["b_e1"],                                                  # [1, H]
        params["b_e2"],                                                  # [1, F]
        jnp.concatenate([params["b_mu"], params["b_var"]], axis=1),      # [1, 2F]
        params["b_dfc"],                                                 # [1, F]
        params["b_d1"],                                                  # [1, H]
        params["b_d2"],                                                  # [1, D_in]
    ]
    offsets, padded, off = [], [], 0
    for seg in segments:
        w = seg.shape[-1]
        wp = _round_up(w, 128)
        offsets.append(off)
        padded.append(jnp.pad(seg, ((0, 0), (0, wp - w))))
        off += wp
    bias_packed = jnp.concatenate(padded, axis=1)                        # [1, off]

    LAT = _round_up(3 * F, 128)

    batch_spec = lambda width: pl.BlockSpec((TILE_B, width), lambda i: (i, 0))
    const_spec = lambda shape: pl.BlockSpec(shape, lambda i: (0, 0))     # VMEM-resident

    kernel = functools.partial(
        _vae_kernel, dims=(D_in, H, F), bias_offsets=tuple(offsets))

    flops = 2 * B_pad * (2 * D_in * H + 2 * H * F + 3 * F * F)
    transcendentals = B_pad * (F + D_in)
    bytes_accessed = (
        4 * B_pad * (D_in + F)                    # x, eps in
        + 2 * (w_e1.size + w_e2.size + w_muvar.size + w_dfc.size + w_d1.size + w_d2.size)
        + 4 * bias_packed.size
        + 4 * B_pad * (D_in + LAT)                # outputs
    )

    x_out_flat, lat = pl.pallas_call(
        kernel,
        out_shape=(
            jax.ShapeDtypeStruct((B_pad, D_in), jnp.float32),   # reconstruction (flat)
            jax.ShapeDtypeStruct((B_pad, LAT), jnp.float32),    # z | mu | log_var | pad
        ),
        grid=grid,
        in_specs=[
            batch_spec(D_in),          # x
            batch_spec(F),             # eps
            const_spec(w_e1.shape),
            const_spec(w_e2.shape),
            const_spec(w_muvar.shape),
            const_spec(w_dfc.shape),
            const_spec(w_d1.shape),
            const_spec(w_d2.shape),
            const_spec(bias_packed.shape),
        ],
        out_specs=(batch_spec(D_in), batch_spec(LAT)),
        compiler_params=pltpu.CompilerParams(
            dimension_semantics=("parallel",)),
        cost_estimate=pl.CostEstimate(
            flops=flops, transcendentals=transcendentals,
            bytes_accessed=bytes_accessed),
    )(x_flat, eps_p, w_e1, w_e2, w_muvar, w_dfc, w_d1, w_d2, bias_packed)

    x_out = x_out_flat[:B].reshape(B, C, I, S)
    z = lat[:B, 0:F]
    mu = lat[:B, F:2 * F]
    log_var = lat[:B, 2 * F:3 * F]
    return x_out, z, mu, log_var


def vae_reference(x, eps, params):
    """Pure-JAX f32 reference of the same forward pass (for sanity checking)."""
    B = x.shape[0]
    xf = x.reshape(B, -1)
    relu = lambda v: jnp.maximum(v, 0.0)
    h = relu(xf @ params["w_e1"] + params["b_e1"])
    z_enc = relu(h @ params["w_e2"] + params["b_e2"])
    mu = z_enc @ params["w_mu"] + params["b_mu"]
    log_var = z_enc @ params["w_var"] + params["b_var"]
    z = mu + eps * jnp.exp(0.5 * log_var)
    d = z @ params["w_dfc"] + params["b_dfc"]
    d = relu(d @ params["w_d1"] + params["b_d1"])
    x_rec = jax.nn.sigmoid(d @ params["w_d2"] + params["b_d2"])
    return x_rec.reshape(x.shape), z, mu, log_var


def init_params(key, d_in, hidden, fc_dim):
    """Deterministic synthetic parameter init (PyTorch Linear shapes, stored
    transposed as [in, out] for row-vector matmul)."""
    ks = jax.random.split(key, 14)

    def lin(k, fan_in, fan_out):
        w = jax.random.normal(k, (fan_in, fan_out), jnp.float32) * (1.0 / jnp.sqrt(fan_in))
        b = jnp.zeros((1, fan_out), jnp.float32)
        return w, b

    p = {}
    p["w_e1"], p["b_e1"] = lin(ks[0], d_in, hidden)      # encoder layer 1
    p["w_e2"], p["b_e2"] = lin(ks[1], hidden, fc_dim)    # encoder layer 2 -> fc_dim
    p["w_mu"], p["b_mu"] = lin(ks[2], fc_dim, fc_dim)    # fc_mu
    p["w_var"], p["b_var"] = lin(ks[3], fc_dim, fc_dim)  # fc_var
    p["w_dfc"], p["b_dfc"] = lin(ks[4], fc_dim, fc_dim)  # decoder_fc
    p["w_d1"], p["b_d1"] = lin(ks[5], fc_dim, hidden)    # decoder layer 1
    p["w_d2"], p["b_d2"] = lin(ks[6], hidden, d_in)      # decoder layer 2 -> recon
    # small nonzero biases so outputs are not trivially symmetric
    for name, k in zip(["b_e1", "b_e2", "b_mu", "b_var", "b_dfc", "b_d1", "b_d2"],
                       ks[7:14]):
        p[name] = 0.01 * jax.random.normal(k, p[name].shape, jnp.float32)
    return p


if __name__ == "__main__":
    # Small shapes consistent with the module: x is [b, c, i, s]
    B, C, I, S = 2, 4, 8, 16
    FC_DIM = 32       # config['fc_dim']
    HIDDEN = 64       # stand-in conv/fc intermediate width
    D_IN = C * I * S

    key = jax.random.PRNGKey(0)
    k_x, k_eps, k_p = jax.random.split(key, 3)

    x = jax.random.normal(k_x, (B, C, I, S), jnp.float32)
    eps = jax.random.normal(k_eps, (B, FC_DIM), jnp.float32)  # reparameterization noise
    params = init_params(k_p, D_IN, HIDDEN, FC_DIM)

    fwd = jax.jit(vae_forward)
    x_out, z, mu, log_var = fwd(x, eps, params)
    jax.block_until_ready((x_out, z, mu, log_var))

    assert x_out.shape == (B, C, I, S)
    assert z.shape == (B, FC_DIM) and mu.shape == (B, FC_DIM) and log_var.shape == (B, FC_DIM)
    assert bool(jnp.all(jnp.isfinite(x_out))) and bool(jnp.all(jnp.isfinite(z)))

    # loose check vs f32 reference (kernel matmuls run bf16 on the MXU)
    xr, zr, mr, lr = vae_reference(x, eps, params)
    assert float(jnp.max(jnp.abs(x_out - xr))) < 0.1
    assert float(jnp.max(jnp.abs(mu - mr))) < 0.1
    assert float(jnp.max(jnp.abs(log_var - lr))) < 0.1
    assert float(jnp.max(jnp.abs(z - zr))) < 0.1

    print("KERNEL_OK")
</pallas_src>

<mosaic_0001>
module attributes {stable_mosaic.version = 11 : i64} {
  func.func @_vae_kernel(%arg0: i32, %arg1: memref<8x512xf32, #tpu.memory_space<vmem>>, %arg2: memref<8x32xf32, #tpu.memory_space<vmem>>, %arg3: memref<512x64xbf16, #tpu.memory_space<vmem>>, %arg4: memref<64x32xbf16, #tpu.memory_space<vmem>>, %arg5: memref<32x64xbf16, #tpu.memory_space<vmem>>, %arg6: memref<32x32xbf16, #tpu.memory_space<vmem>>, %arg7: memref<32x64xbf16, #tpu.memory_space<vmem>>, %arg8: memref<64x512xbf16, #tpu.memory_space<vmem>>, %arg9: memref<1x1152xf32, #tpu.memory_space<vmem>>, %arg10: memref<8x512xf32, #tpu.memory_space<vmem>>, %arg11: memref<8x128xf32, #tpu.memory_space<vmem>>) attributes {dimension_semantics = [#tpu.dimension_semantics<parallel>], iteration_bounds = array<i64: 1>, scalar_prefetch = 0 : i64, scratch_operands = 0 : i64, tpu.core_type = #tpu.core_type<tc>, window_params = [{transform_indices = @transform_0, window_bounds = array<i64: 8, 512>}, {transform_indices = @transform_1, window_bounds = array<i64: 8, 32>}, {pipeline_mode = #tpu.pipeline_mode<synchronous>, transform_indices = @transform_2, window_bounds = array<i64: 512, 64>}, {pipeline_mode = #tpu.pipeline_mode<synchronous>, transform_indices = @transform_3, window_bounds = array<i64: 64, 32>}, {pipeline_mode = #tpu.pipeline_mode<synchronous>, transform_indices = @transform_4, window_bounds = array<i64: 32, 64>}, {pipeline_mode = #tpu.pipeline_mode<synchronous>, transform_indices = @transform_5, window_bounds = array<i64: 32, 32>}, {pipeline_mode = #tpu.pipeline_mode<synchronous>, transform_indices = @transform_6, window_bounds = array<i64: 32, 64>}, {pipeline_mode = #tpu.pipeline_mode<synchronous>, transform_indices = @transform_7, window_bounds = array<i64: 64, 512>}, {pipeline_mode = #tpu.pipeline_mode<synchronous>, transform_indices = @transform_8, window_bounds = array<i64: 1, 1152>}, {transform_indices = @transform_9, window_bounds = array<i64: 8, 512>}, {transform_indices = @transform_10, window_bounds = array<i64: 8, 128>}]} {
    %c0 = arith.constant 0 : index
    %c0_0 = arith.constant 0 : index
    %0 = vector.load %arg1[%c0, %c0_0] : memref<8x512xf32, #tpu.memory_space<vmem>>, vector<8x512xf32>
    %1 = arith.truncf %0 : vector<8x512xf32> to vector<8x512xbf16>
    %c0_1 = arith.constant 0 : index
    %c0_2 = arith.constant 0 : index
    %2 = vector.load %arg3[%c0_1, %c0_2] : memref<512x64xbf16, #tpu.memory_space<vmem>>, vector<512x64xbf16>
    %cst = arith.constant dense<0.000000e+00> : vector<8x64xf32>
    %3 = tpu.matmul %1, %2, %cst {dimension_numbers = #tpu.dot_dimension_numbers<[1], [0], [0], [1], [0, 0, 1, 1], [], []>} : vector<8x512xbf16>, vector<512x64xbf16>, vector<8x64xf32> -> vector<8x64xf32>
    %c0_3 = arith.constant 0 : index
    %c0_4 = arith.constant 0 : index
    %4 = vector.load %arg9[%c0_3, %c0_4] : memref<1x1152xf32, #tpu.memory_space<vmem>>, vector<1x64xf32>
    %5 = vector.broadcast %4 : vector<1x64xf32> to vector<8x64xf32>
    %6 = arith.addf %3, %5 : vector<8x64xf32>
    %cst_5 = arith.constant 0.000000e+00 : f32
    %7 = vector.broadcast %cst_5 : f32 to vector<8x64xf32>
    %8 = arith.maximumf %6, %7 : vector<8x64xf32>
    %9 = arith.truncf %8 : vector<8x64xf32> to vector<8x64xbf16>
    %c0_6 = arith.constant 0 : index
    %c0_7 = arith.constant 0 : index
    %10 = vector.load %arg4[%c0_6, %c0_7] : memref<64x32xbf16, #tpu.memory_space<vmem>>, vector<64x32xbf16>
    %cst_8 = arith.constant dense<0.000000e+00> : vector<8x32xf32>
    %11 = tpu.matmul %9, %10, %cst_8 {dimension_numbers = #tpu.dot_dimension_numbers<[1], [0], [0], [1], [0, 0, 1, 1], [], []>} : vector<8x64xbf16>, vector<64x32xbf16>, vector<8x32xf32> -> vector<8x32xf32>
    %c0_9 = arith.constant 0 : index
    %c128 = arith.constant 128 : index
    %12 = vector.load %arg9[%c0_9, %c128] : memref<1x1152xf32, #tpu.memory_space<vmem>>, vector<1x32xf32>
    %13 = vector.broadcast %12 : vector<1x32xf32> to vector<8x32xf32>
    %14 = arith.addf %11, %13 : vector<8x32xf32>
    %cst_10 = arith.constant 0.000000e+00 : f32
    %15 = vector.broadcast %cst_10 : f32 to vector<8x32xf32>
    %16 = arith.maximumf %14, %15 : vector<8x32xf32>
    %17 = arith.truncf %16 : vector<8x32xf32> to vector<8x32xbf16>
    %c0_11 = arith.constant 0 : index
    %c0_12 = arith.constant 0 : index
    %18 = vector.load %arg5[%c0_11, %c0_12] : memref<32x64xbf16, #tpu.memory_space<vmem>>, vector<32x64xbf16>
    %cst_13 = arith.constant dense<0.000000e+00> : vector<8x64xf32>
    %19 = tpu.matmul %17, %18, %cst_13 {dimension_numbers = #tpu.dot_dimension_numbers<[1], [0], [0], [1], [0, 0, 1, 1], [], []>} : vector<8x32xbf16>, vector<32x64xbf16>, vector<8x64xf32> -> vector<8x64xf32>
    %c0_14 = arith.constant 0 : index
    %c256 = arith.constant 256 : index
    %20 = vector.load %arg9[%c0_14, %c256] : memref<1x1152xf32, #tpu.memory_space<vmem>>, vector<1x64xf32>
    %21 = vector.broadcast %20 : vector<1x64xf32> to vector<8x64xf32>
    %22 = arith.addf %19, %21 : vector<8x64xf32>
    %23 = vector.extract_strided_slice %22 {offsets = [0, 0], sizes = [8, 32], strides = [1, 1]} : vector<8x64xf32> to vector<8x32xf32>
    %24 = vector.extract_strided_slice %22 {offsets = [0, 32], sizes = [8, 32], strides = [1, 1]} : vector<8x64xf32> to vector<8x32xf32>
    %cst_15 = arith.constant 5.000000e-01 : f32
    %25 = vector.broadcast %cst_15 : f32 to vector<8x32xf32>
    %26 = arith.mulf %25, %24 : vector<8x32xf32>
    %27 = math.exp %26 : vector<8x32xf32>
    %c0_16 = arith.constant 0 : index
    %c0_17 = arith.constant 0 : index
    %28 = vector.load %arg2[%c0_16, %c0_17] : memref<8x32xf32, #tpu.memory_space<vmem>>, vector<8x32xf32>
    %29 = arith.mulf %28, %27 : vector<8x32xf32>
    %30 = arith.addf %23, %29 : vector<8x32xf32>
    %31 = arith.truncf %30 : vector<8x32xf32> to vector<8x32xbf16>
    %c0_18 = arith.constant 0 : index
    %c0_19 = arith.constant 0 : index
    %32 = vector.load %arg6[%c0_18, %c0_19] : memref<32x32xbf16, #tpu.memory_space<vmem>>, vector<32x32xbf16>
    %cst_20 = arith.constant dense<0.000000e+00> : vector<8x32xf32>
    %33 = tpu.matmul %31, %32, %cst_20 {dimension_numbers = #tpu.dot_dimension_numbers<[1], [0], [0], [1], [0, 0, 1, 1], [], []>} : vector<8x32xbf16>, vector<32x32xbf16>, vector<8x32xf32> -> vector<8x32xf32>
    %c0_21 = arith.constant 0 : index
    %c384 = arith.constant 384 : index
    %34 = vector.load %arg9[%c0_21, %c384] : memref<1x1152xf32, #tpu.memory_space<vmem>>, vector<1x32xf32>
    %35 = vector.broadcast %34 : vector<1x32xf32> to vector<8x32xf32>
    %36 = arith.addf %33, %35 : vector<8x32xf32>
    %37 = arith.truncf %36 : vector<8x32xf32> to vector<8x32xbf16>
    %c0_22 = arith.constant 0 : index
    %c0_23 = arith.constant 0 : index
    %38 = vector.load %arg7[%c0_22, %c0_23] : memref<32x64xbf16, #tpu.memory_space<vmem>>, vector<32x64xbf16>
    %cst_24 = arith.constant dense<0.000000e+00> : vector<8x64xf32>
    %39 = tpu.matmul %37, %38, %cst_24 {dimension_numbers = #tpu.dot_dimension_numbers<[1], [0], [0], [1], [0, 0, 1, 1], [], []>} : vector<8x32xbf16>, vector<32x64xbf16>, vector<8x64xf32> -> vector<8x64xf32>
    %c0_25 = arith.constant 0 : index
    %c512 = arith.constant 512 : index
    %40 = vector.load %arg9[%c0_25, %c512] : memref<1x1152xf32, #tpu.memory_space<vmem>>, vector<1x64xf32>
    %41 = vector.broadcast %40 : vector<1x64xf32> to vector<8x64xf32>
    %42 = arith.addf %39, %41 : vector<8x64xf32>
    %cst_26 = arith.constant 0.000000e+00 : f32
    %43 = vector.broadcast %cst_26 : f32 to vector<8x64xf32>
    %44 = arith.maximumf %42, %43 : vector<8x64xf32>
    %45 = arith.truncf %44 : vector<8x64xf32> to vector<8x64xbf16>
    %c0_27 = arith.constant 0 : index
    %c0_28 = arith.constant 0 : index
    %46 = vector.load %arg8[%c0_27, %c0_28] : memref<64x512xbf16, #tpu.memory_space<vmem>>, vector<64x512xbf16>
    %cst_29 = arith.constant dense<0.000000e+00> : vector<8x512xf32>
    %47 = tpu.matmul %45, %46, %cst_29 {dimension_numbers = #tpu.dot_dimension_numbers<[1], [0], [0], [1], [0, 0, 1, 1], [], []>} : vector<8x64xbf16>, vector<64x512xbf16>, vector<8x512xf32> -> vector<8x512xf32>
    %c0_30 = arith.constant 0 : index
    %c640 = arith.constant 640 : index
    %48 = vector.load %arg9[%c0_30, %c640] : memref<1x1152xf32, #tpu.memory_space<vmem>>, vector<1x512xf32>
    %49 = vector.broadcast %48 : vector<1x512xf32> to vector<8x512xf32>
    %50 = arith.addf %47, %49 : vector<8x512xf32>
    %51 = arith.negf %50 : vector<8x512xf32>
    %52 = math.exp %51 : vector<8x512xf32>
    %cst_31 = arith.constant 1.000000e+00 : f32
    %53 = vector.broadcast %cst_31 : f32 to vector<8x512xf32>
    %54 = arith.addf %53, %52 : vector<8x512xf32>
    %55 = arith.divf %53, %54 : vector<8x512xf32>
    %c0_32 = arith.constant 0 : index
    %c0_33 = arith.constant 0 : index
    %56 = vector.load %arg10[%c0_32, %c0_33] : memref<8x512xf32, #tpu.memory_space<vmem>>, vector<8x512xf32>
    tpu.vector_store %arg10[%c0_32, %c0_33], %55 {strides = array<i32>} : memref<8x512xf32, #tpu.memory_space<vmem>>, vector<8x512xf32>,
    %57 = tpu.concatenate %30, %23, %24 in 1 : vector<8x32xf32>, vector<8x32xf32>, vector<8x32xf32> -> vector<8x96xf32>
    %cst_34 = arith.constant 0.000000e+00 : f32
    %58 = vector.broadcast %cst_34 : f32 to vector<8x32xf32>
    %59 = tpu.concatenate %57, %58 in 1 : vector<8x96xf32>, vector<8x32xf32> -> vector<8x128xf32>
    %c0_35 = arith.constant 0 : index
    %c0_36 = arith.constant 0 : index
    %60 = vector.load %arg11[%c0_35, %c0_36] : memref<8x128xf32, #tpu.memory_space<vmem>>, vector<8x128xf32>
    tpu.vector_store %arg11[%c0_35, %c0_36], %59 {strides = array<i32>} : memref<8x128xf32, #tpu.memory_space<vmem>>, vector<8x128xf32>,
    return
  }
  func.func @transform_0(%arg0: i32) -> (i32, i32) {
    %c0_i32 = arith.constant 0 : i32
    %c0_i32_0 = arith.constant 0 : i32
    return %arg0, %c0_i32 : i32, i32
  }
  func.func @transform_1(%arg0: i32) -> (i32, i32) {
    %c0_i32 = arith.constant 0 : i32
    %c0_i32_0 = arith.constant 0 : i32
    return %arg0, %c0_i32 : i32, i32
  }
  func.func @transform_2(%arg0: i32) -> (i32, i32) {
    %c0_i32 = arith.constant 0 : i32
    %c0_i32_0 = arith.constant 0 : i32
    %c0_i32_1 = arith.constant 0 : i32
    return %c0_i32, %c0_i32_0 : i32, i32
  }
  func.func @transform_3(%arg0: i32) -> (i32, i32) {
    %c0_i32 = arith.constant 0 : i32
    %c0_i32_0 = arith.constant 0 : i32
    %c0_i32_1 = arith.constant 0 : i32
    return %c0_i32, %c0_i32_0 : i32, i32
  }
  func.func @transform_4(%arg0: i32) -> (i32, i32) {
    %c0_i32 = arith.constant 0 : i32
    %c0_i32_0 = arith.constant 0 : i32
    %c0_i32_1 = arith.constant 0 : i32
    return %c0_i32, %c0_i32_0 : i32, i32
  }
  func.func @transform_5(%arg0: i32) -> (i32, i32) {
    %c0_i32 = arith.constant 0 : i32
    %c0_i32_0 = arith.constant 0 : i32
    %c0_i32_1 = arith.constant 0 : i32
    return %c0_i32, %c0_i32_0 : i32, i32
  }
  func.func @transform_6(%arg0: i32) -> (i32, i32) {
    %c0_i32 = arith.constant 0 : i32
    %c0_i32_0 = arith.constant 0 : i32
    %c0_i32_1 = arith.constant 0 : i32
    return %c0_i32, %c0_i32_0 : i32, i32
  }
  func.func @transform_7(%arg0: i32) -> (i32, i32) {
    %c0_i32 = arith.constant 0 : i32
    %c0_i32_0 = arith.constant 0 : i32
    %c0_i32_1 = arith.constant 0 : i32
    return %c0_i32, %c0_i32_0 : i32, i32
  }
  func.func @transform_8(%arg0: i32) -> (i32, i32) {
    %c0_i32 = arith.constant 0 : i32
    %c0_i32_0 = arith.constant 0 : i32
    %c0_i32_1 = arith.constant 0 : i32
    return %c0_i32, %c0_i32_0 : i32, i32
  }
  func.func @transform_9(%arg0: i32) -> (i32, i32) {
    %c0_i32 = arith.constant 0 : i32
    %c0_i32_0 = arith.constant 0 : i32
    return %arg0, %c0_i32 : i32, i32
  }
  func.func @transform_10(%arg0: i32) -> (i32, i32) {
    %c0_i32 = arith.constant 0 : i32
    %c0_i32_0 = arith.constant 0 : i32
    return %arg0, %c0_i32 : i32, i32
  }
}

</mosaic_0001>

<bundles_post_ra>
// kernel: vae_forward.1
= control target key start
LH: loop header
LB: loop body
LE: loop exit
PB: predicated region body
PF: predicated region fallthrough
CT: control target
= control target key end

     0   :  { %v1190_v39 = vmov 0.0   ;;  %vm1191_vm0 = vmmov 0   ;;  %vm427_vm1 = vcmask 523264   ;;  %vm496_vm2 = vcmask 261120   ;;  %s1193_s25 = smov 32   ;;  %s1498_s2 = inlined_call_operand.vmem [shape: bf16[512,64], index: 2, kind: input, shape index: {}]   ;;  %s1499_s0 = inlined_call_operand.vmem [shape: f32[8,512], index: 0, kind: input, shape index: {}]   ;;  %s1500_s3 = inlined_call_operand.vmem [shape: bf16[64,32], index: 3, kind: input, shape index: {}]   ;;  %s1501_s4 = inlined_call_operand.vmem [shape: bf16[32,64], index: 4, kind: input, shape index: {}]   ;;  %s1502_s8 = inlined_call_operand.vmem [shape: f32[1,1152], index: 8, kind: input, shape index: {}]   ;;  %s1503_s5 = inlined_call_operand.vmem [shape: bf16[32,32], index: 5, kind: input, shape index: {}]   ;;  %s1504_s6 = inlined_call_operand.vmem [shape: bf16[32,64], index: 6, kind: input, shape index: {}]   ;;  %s1505_s1 = inlined_call_operand.vmem [shape: f32[8,32], index: 1, kind: input, shape index: {}]   ;;  %s1506_s10 = inlined_call_operand.vmem [shape: f32[8,128], index: 10, kind: output, shape index: {1}]   ;;  %s1507_s7 = inlined_call_operand.vmem [shape: bf16[64,512], index: 7, kind: input, shape index: {}]   ;;  %s1508_s9 = inlined_call_operand.vmem [shape: f32[8,512], index: 9, kind: output, shape index: {0}]  }
   0x1   :  { %v1106_v0 = vld [vmem:[%s1498_s2 + $0x40] sm:$0xff]   ;;  %v1110_v4 = vld [vmem:[%s1498_s2 + $0x48] sm:$0xff]   ;;  %v1114_v8 = vld [vmem:[%s1498_s2 + $0x50] sm:$0xff]   ;;  %vm923_vm3 = vcmask 785408  }
   0x2   :  { %v1107_v1 = vld [vmem:[%s1498_s2 + $0xc0] sm:$0xff]   ;;  %1007 = vmatprep.subr.bf16.mxu0 %v1106_v0  ;;  %v1111_v5 = vld [vmem:[%s1498_s2 + $0xc8] sm:$0xff]   ;;  %v1115_v9 = vld [vmem:[%s1498_s2 + $0xd0] sm:$0xff]  }
   0x3   :  { %v1108_v2 = vld [vmem:[%s1498_s2] sm:$0xff]   ;;  %1029 = vmatprep.subr.bf16.mxu1 %v1107_v1  ;;  %v1112_v6 = vld [vmem:[%s1498_s2 + $0x8] sm:$0xff]   ;;  %v1116_v10 = vld [vmem:[%s1498_s2 + $0x10] sm:$0xff]  }
   0x4   :  { %v1109_v3 = vld [vmem:[%s1498_s2 + $0x80] sm:$0xff]   ;;  %1008 = vmatpush3.bf16.msra.mxu0 %v1108_v2  ;;  %v1113_v7 = vld [vmem:[%s1498_s2 + $0x88] sm:$0xff]   ;;  %v1117_v11 = vld [vmem:[%s1498_s2 + $0x90] sm:$0xff]  }
   0x5   :  { %1030 = vmatpush3.bf16.msra.mxu1 %v1109_v3  ;;  %1009 = vmatprep.subr.bf16.mxu0 %v1110_v4  ;;  %v1118_v12 = vld [vmem:[%s1498_s2 + $0x58] sm:$0xff]   ;;  %v1122_v16 = vld [vmem:[%s1498_s2 + $0x60] sm:$0xff]   ;;  %v1126_v20 = vld [vmem:[%s1498_s2 + $0x68] sm:$0xff]  }
   0x6   :  { %1031 = vmatprep.subr.bf16.mxu1 %v1111_v5  ;;  %v1119_v13 = vld [vmem:[%s1498_s2 + $0xd8] sm:$0xff]   ;;  %v1123_v17 = vld [vmem:[%s1498_s2 + $0xe0] sm:$0xff]   ;;  %v1127_v21 = vld [vmem:[%s1498_s2 + $0xe8] sm:$0xff]  }
   0x7   :  { %v1120_v14 = vld [vmem:[%s1498_s2 + $0x18] sm:$0xff]   ;;  %v1124_v18 = vld [vmem:[%s1498_s2 + $0x20] sm:$0xff]   ;;  %v1128_v22 = vld [vmem:[%s1498_s2 + $0x28] sm:$0xff]  }
   0x8   :  { %1010 = vmatpush3.bf16.msra.mxu0 %v1112_v6  ;;  %v1121_v15 = vld [vmem:[%s1498_s2 + $0x98] sm:$0xff]   ;;  %v1125_v19 = vld [vmem:[%s1498_s2 + $0xa0] sm:$0xff]   ;;  %v1129_v23 = vld [vmem:[%s1498_s2 + $0xa8] sm:$0xff]  }
   0x9   :  { %1032 = vmatpush3.bf16.msra.mxu1 %v1113_v7  ;;  %1011 = vmatprep.subr.bf16.mxu0 %v1114_v8  ;;  %v1130_v24 = vld [vmem:[%s1498_s2 + $0x70] sm:$0xff]   ;;  %v1134_v28 = vld [vmem:[%s1498_s2 + $0x78] sm:$0xff]   ;;  %v36_v32 = vld [vmem:[%s1499_s0 + $0x8] sm:$0xff] }
   0xa   :  { %1033 = vmatprep.subr.bf16.mxu1 %v1115_v9  ;;  %v1131_v25 = vld [vmem:[%s1498_s2 + $0xf0] sm:$0xff]   ;;  %v1135_v29 = vld [vmem:[%s1498_s2 + $0xf8] sm:$0xff]   ;;  %v35_v34 = vld [vmem:[%s1499_s0] sm:$0xff]  ;;  %v40_v35 = vpack.c.bf16 %v36_v32, %v36_v32 }
   0xb   :  { %v1132_v26 = vld [vmem:[%s1498_s2 + $0x30] sm:$0xff]   ;;  %v1136_v30 = vld [vmem:[%s1498_s2 + $0x38] sm:$0xff]   ;;  %v39_v37 = vpack.c.bf16 %v35_v34, %v35_v34  ;;  %v1138_v41 = vld [vmem:[%s1500_s3] sm:$0xff]  }
   0xc   :  { %1012 = vmatpush3.bf16.msra.mxu0 %v1116_v10  ;;  %v1133_v27 = vld [vmem:[%s1498_s2 + $0xb0] sm:$0xff]   ;;  %v1137_v31 = vld [vmem:[%s1498_s2 + $0xb8] sm:$0xff]   ;;  %338 = vmatprep.mubr.bf16.mxu0 %v40_v35  ;;  %v1139_v42 = vld [vmem:[%s1500_s3 + $0x8] sm:$0xff]   ;;  %s1192_s2 = smov 96  }
   0xd   :  { %1034 = vmatpush3.bf16.msra.mxu1 %v1117_v11  ;;  %1013 = vmatprep.subr.bf16.mxu0 %v1118_v12  ;;  %v38_v33 = vld [vmem:[%s1499_s0 + $0x18] sm:$0xff]  ;;  %v37_v38 = vld [vmem:[%s1499_s0 + $0x10] sm:$0xff]  ;;  %v1142_v45 = vld [vmem:[%s1501_s4] sm:$0xff]  }
   0xe   :  { %1035 = vmatprep.subr.bf16.mxu1 %v1119_v13  ;;  %v42_v36 = vpack.c.bf16 %v38_v33, %v38_v33  ;;  %v41_v40 = vpack.c.bf16 %v37_v38, %v37_v38  ;;  %v1140_v43 = vld [vmem:[%s1500_s3 + $0x10] sm:$0xff]   ;;  %v1141_v44 = vld [vmem:[%s1500_s3 + $0x18] sm:$0xff]   ;;  %v934_v48 = vld [vmem:[%s1502_s8] ss:$0 sm:$0xff] }
   0xf   :  { %v1143_v61 = vld [vmem:[%s1501_s4 + $0x8] sm:$0xff]   ;;  %v967_v62 = vld [vmem:[%s1502_s8 + $0x1] ss:$0 sm:$0xff]  ;;  %v973_v7 = vld [vmem:[%s1502_s8 + $0x2] ss:$0 sm:$0xff] }
  0x10   :  { %1014 = vmatpush3.bf16.msra.mxu0 %v1120_v14  ;;  %378 = vmatprep.mubr.bf16.mxu1 %v42_v36  ;;  %v1144_v6 = vld [vmem:[%s1503_s5] sm:$0xff]  }
  0x11   :  { %1036 = vmatpush3.bf16.msra.mxu1 %v1121_v15  ;;  %1015 = vmatprep.subr.bf16.mxu0 %v1122_v16  ;;  %v1145_v15 = vld [vmem:[%s1503_s5 + $0x8] sm:$0xff]   ;;  %v1146_v16 = vld [vmem:[%s1504_s6] sm:$0xff]  }
  0x12   :  { %1037 = vmatprep.subr.bf16.mxu1 %v1123_v17  ;;  %v1154_v32 = vld [vmem:[%s1507_s7 + $0x20] ss:$16 sps:$4 sm:$0xff]   ;;  %v1162_v33 = vld [vmem:[%s1507_s7 + $0x44] ss:$16 sps:$4 sm:$0xff]  }
  0x13   :  { %v1160_v34 = vld [vmem:[%s1507_s7 + $0x40] ss:$16 sps:$4 sm:$0xff]  }
  0x14   :  { %1016 = vmatpush3.bf16.msra.mxu0 %v1124_v18  ;;  %v543_v18 = vld [vmem:[%s1505_s1] sm:$0xff] }
  0x15   :  { %1038 = vmatpush3.bf16.msra.mxu1 %v1125_v19  ;;  %1017 = vmatprep.subr.bf16.mxu0 %v1126_v20  ;;  %v977_v35 = vld [vmem:[%s1502_s8 + $0x3] ss:$0 sm:$0xff] }
  0x16   :  { %1039 = vmatprep.subr.bf16.mxu1 %v1127_v21 }
  0x18   :  { %1018 = vmatpush3.bf16.msra.mxu0 %v1128_v22 }
  0x19   :  { %1040 = vmatpush3.bf16.msra.mxu1 %v1129_v23  ;;  %1019 = vmatprep.subr.bf16.mxu0 %v1130_v24 }
  0x1a   :  { %1041 = vmatprep.subr.bf16.mxu1 %v1131_v25 }
  0x1c   :  { %1020 = vmatpush3.bf16.msra.mxu0 %v1132_v26 }
  0x1d   :  { %1042 = vmatpush3.bf16.msra.mxu1 %v1133_v27  ;;  %1021 = vmatprep.subr.bf16.mxu0 %v1134_v28  ;;  %v1147_v27 = vld [vmem:[%s1504_s6 + $0x8] sm:$0xff]   ;;  %v1148_v28 = vld [vmem:[%s1507_s7] ss:$16 sps:$4 sm:$0xff]  }
  0x1e   :  { %1043 = vmatprep.subr.bf16.mxu1 %v1135_v29  ;;  %v1150_v29 = vld [vmem:[%s1507_s7 + $0x4] ss:$16 sps:$4 sm:$0xff]  }
  0x20   :  { %1022 = vmatpush3.bf16.msra.mxu0 %v1136_v30  ;;  %v1153_v30 = vld [vmem:[%s1507_s7 + $0xc] ss:$16 sps:$4 sm:$0xff]  }
  0x21   :  { %1044 = vmatpush3.bf16.msra.mxu1 %v1137_v31  ;;  %1065 = vmatprep.subr.bf16.mxu0 %v1190_v39  ;;  %v1156_v31 = vld [vmem:[%s1507_s7 + $0x24] ss:$16 sps:$4 sm:$0xff]  }
  0x22   :  { %1077 = vmatprep.subr.bf16.mxu1 %v1190_v39 }
  0x23   :  { %339 = vmatmul.mubr.bf16.vlgmr.msra.gmra.mrb[0].mxu0 %v39_v37 }
  0x24   :  { %379 = vmatmul.mubr.bf16.vlgmr.msra.gmra.mrb[0].mxu1 %v41_v40  ;;  %1066 = vmatpush3.bf16.msra.mxu0 %v1138_v41  ;;  %v1151_v40 = vld [vmem:[%s1507_s7 + $0x8] ss:$16 sps:$4 sm:$0xff]  }
  0x25   :  { %1067 = vmatprep.subr.bf16.mxu0 %v1190_v39  ;;  %1073 = vmatprep.mubr.msk.bf16.mxu0 %vm1191_vm0, %v1190_v39 }
  0x26   :  { %1081 = vmatprep.mubr.msk.bf16.mxu1 %vm1191_vm0, %v1190_v39  ;;  %1078 = vmatpush3.bf16.msra.mxu1 %v1142_v45  ;;  %v1165_v45 = vld [vmem:[%s1507_s7 + $0x4c] ss:$16 sps:$4 sm:$0xff]  }
  0x27   :  { %1079 = vmatprep.subr.bf16.mxu1 %v1190_v39 }
  0x28   :  { %1068 = vmatpush3.bf16.msra.mxu0 %v1139_v42 }
  0x29   :  { %1069 = vmatprep.subr.bf16.mxu0 %v1190_v39 }
  0x2a   :  { %1080 = vmatpush3.bf16.msra.mxu1 %v1143_v61 }
  0x2b   :  { %1085 = vmatprep.subr.bf16.mxu1 %v1190_v39 }
  0x2c   :  { %1070 = vmatpush3.bf16.msra.mxu0 %v1140_v43  ;;  %v1159_v43 = vld [vmem:[%s1507_s7 + $0x2c] ss:$16 sps:$4 sm:$0xff]  }
  0x2d   :  { %1071 = vmatprep.subr.bf16.mxu0 %v1190_v39 }
  0x30   :  { %1072 = vmatpush3.bf16.msra.mxu0 %v1141_v44  ;;  %v1157_v44 = vld [vmem:[%s1507_s7 + $0x28] ss:$16 sps:$4 sm:$0xff]  }
  0x31   :  { %1093 = vmatprep.subr.bf16.mxu0 %v1190_v39 }
  0xf6   :  { %v1023_v46 = vpop.f32.mrb[0].mxu0 }
  0xf7   :  { %v1045_v47 = vpop.f32.mrb[0].mxu1  ;;  %v1024_v49 = vpop.f32.mrb[1].mxu0 }
  0xf8   :  { %v1046_v50 = vpop.f32.mrb[1].mxu1  ;;  %v1025_v51 = vadd.f32 %v1024_v49, %v1023_v46  ;;  %v1026_v53 = vpop.f32.mrb[2].mxu0  ;;  %v1163_v46 = vld [vmem:[%s1507_s7 + $0x48] ss:$16 sps:$4 sm:$0xff]   ;;  %v1166_v49 = vld [vmem:[%s1507_s7 + $0x60] ss:$16 sps:$4 sm:$0xff]  }
  0xf9   :  { %v1047_v52 = vadd.f32 %v1046_v50, %v1045_v47  ;;  %v1048_v54 = vpop.f32.mrb[2].mxu1  ;;  %v1027_v55 = vpop.f32.mrb[3].mxu0  ;;  %v1168_v47 = vld [vmem:[%s1507_s7 + $0x64] ss:$16 sps:$4 sm:$0xff]   ;;  %v1169_v50 = vld [vmem:[%s1507_s7 + $0x68] ss:$16 sps:$4 sm:$0xff]  }
  0xfa   :  { %v1049_v56 = vpop.f32.mrb[3].mxu1  ;;  %v341_v57 = vadd.f32 %v1025_v51, %v934_v48  ;;  %v1171_v48 = vld [vmem:[%s1507_s7 + $0x6c] ss:$16 sps:$4 sm:$0xff]   ;;  %v1194_v51 = vmov 0  }
  0xfc   :  { %v381_v58 = vadd.f32 %v1047_v52, %v341_v57  ;;  %v981_v52 = vld [vmem:[%s1502_s8 + $0x4] ss:$0 sm:$0xff] }
  0xfe   :  { %v386_v59 = vmax.f32 %v381_v58, 0.0 }
 0x100   :  { %v387_v60 = vpack.c.bf16 %v386_v59, %v386_v59 }
 0x102   :  { %1074 = vmatmul.mubr.msk.bf16.vlgmr.msra.gmra.mrb[4].mxu0 %vm427_vm1, %v387_v60  ;;  %v704_v60 = vlaneseq }
 0x103   :  { %1097 = vmatprep.mubr.msk.bf16.mxu0 %vm1191_vm0, %v1190_v39  ;;  %1094 = vmatpush3.bf16.msra.mxu0 %v1146_v16 }
 0x104   :  { %1095 = vmatprep.subr.bf16.mxu0 %v1190_v39  ;;  %v705_v61 = vshrl.u32 %v704_v60, 7 }
 0x107   :  { %1096 = vmatpush3.bf16.msra.mxu0 %v1147_v27 }
 0x108   :  { %848 = vmatprep.subr.bf16.mxu0 %v1153_v30 }
 0x1d5   :  { %v465_v63 = vpop.f32.mrb[4].mxu0 }
 0x1d6   :  { %v466_v0 = vadd.f32 %v967_v62, %v465_v63  ;;  %v1075_v1 = vpop.f32.mrb[5].mxu0  ;;  %v706_v62 = vsub.s32 0, %v705_v61  ;;  %v714_v63 = vsub.s32 2, %v705_v61 }
 0x1d7   :  { %v468_v2 = vpop.f32.mrb[6].mxu0  ;;  %v710_v1 = vsub.s32 1, %v705_v61 }
 0x1d8   :  { %v471_v3 = vmax.f32 %v466_v0, 0.0  ;;  %v1076_v4 = vpop.f32.mrb[7].mxu0  ;;  %v702_v0 = vld [vmem:[%s1502_s8 + $0x5] sm:$0xf]  ;;  %v718_v2 = vsub.s32 3, %v705_v61 }
 0x1d9   :  { %v715_v4 = vrot.slane %v702_v0, %v714_v63 }
 0x1da   :  { %v472_v5 = vpack.c.bf16 %v471_v3, %v471_v3  ;;  %v707_v3 = vrot.slane %v702_v0, %v706_v62 }
 0x1dc   :  { %1082 = vmatmul.mubr.msk.bf16.vlgmr.msra.gmra.mrb[4].mxu1 %vm496_vm2, %v472_v5  ;;  %v711_v5 = vrot.slane %v702_v0, %v710_v1 }
 0x1dd   :  { %1089 = vmatprep.mubr.msk.bf16.mxu1 %vm1191_vm0, %v1190_v39  ;;  %1086 = vmatpush3.bf16.msra.mxu1 %v1144_v6  ;;  %v719_v6 = vrot.slane %v702_v0, %v718_v2 }
 0x1de   :  { %1087 = vmatprep.subr.bf16.mxu1 %v1190_v39 }
 0x1e1   :  { %1088 = vmatpush3.bf16.msra.mxu1 %v1145_v15 }
 0x1e2   :  { %807 = vmatprep.subr.bf16.mxu1 %v1150_v29 }
 0x2af   :  { %v534_v8 = vpop.f32.mrb[4].mxu1 }
 0x2b0   :  { %v535_v9 = vadd.f32 %v973_v7, %v534_v8  ;;  %v1083_v10 = vpop.f32.mrb[5].mxu1 }
 0x2b1   :  { %v537_v11 = vpop.f32.mrb[6].mxu1 }
 0x2b2   :  { %v540_v12 = vmul.f32 0.5, %v535_v9  ;;  %v1084_v13 = vpop.f32.mrb[7].mxu1 }
 0x2b4   :  { %v541_v14 = vmul.f32 1.442695, %v540_v12 }
 0x2b6   :  { %1172 = vpow2.f32 %v541_v14 }
 0x2c0   :  { %v1173_v17 = vpop.eup %1172 }
 0x2c1   :  { %545 = vrot.lane.b32.xlu0 %v1173_v17, %s1192_s2 }
 0x2c5   :  { %918 = vrot.lane.b32.xlu0 %v535_v9, %s1193_s25 }
 0x333   :  { %v546_v19 = vpop.permute.xlu0 %545 }
 0x334   :  { %v548_v20 = vmul.f32 %v546_v19, %v543_v18 }
 0x336   :  { %v549_v21 = vadd.f32 %v548_v20, %v535_v9 }
 0x337   :  { %v919_v22 = vpop.permute.xlu0 %918 }
 0x338   :  { %v550_v23 = vpack.c.bf16 %v549_v21, %v549_v21  ;;  %v921_v24 = vsel %vm496_vm2, %v549_v21, %v919_v22 }
 0x339   :  { %v922_v25 = vsel %vm427_vm1, %v921_v24, %v919_v22 }
 0x33a   :  { %v924_v26 = vsel %vm923_vm3, %v922_v25, 0.0  ;;  %1090 = vmatmul.mubr.msk.bf16.vlgmr.msra.gmra.mrb[8].mxu1 %vm496_vm2, %v550_v23 }
 0x33b   :  { %925 = vst [vmem:[%s1506_s10] sm:$0xff] %v924_v26  ;;  %808 = vmatpush1.bf16.msra.mxu1 %v1148_v28  ;;  %839 = vmatprep.mubr.bf16.mxu1 %v1194_v51 }
 0x33c   :  { %809 = vmatprep.subr.bf16.mxu1 %v1156_v31 }
 0x33f   :  { %810 = vmatpush1.bf16.msra.mxu1 %v1154_v32 }
 0x340   :  { %811 = vmatprep.subr.bf16.mxu1 %v1162_v33 }
 0x343   :  { %812 = vmatpush1.bf16.msra.mxu1 %v1160_v34 }
 0x344   :  { %813 = vmatprep.subr.bf16.mxu1 %v1168_v47 }
 0x347   :  { %814 = vmatpush1.bf16.msra.mxu1 %v1166_v49 }
 0x40d   :  { %v611_v36 = vpop.f32.mrb[8].mxu1 }
 0x40e   :  { %v612_v37 = vadd.f32 %v977_v35, %v611_v36  ;;  %v1091_v38 = vpop.f32.mrb[9].mxu1 }
 0x40f   :  { %v614_v39 = vpop.f32.mrb[10].mxu1 }
 0x410   :  { %v617_v41 = vpack.c.bf16 %v612_v37, %v612_v37  ;;  %v1092_v42 = vpop.f32.mrb[11].mxu1 }
 0x412   :  { %1098 = vmatmul.mubr.msk.bf16.vlgmr.msra.gmra.mrb[8].mxu0 %vm496_vm2, %v617_v41 }
 0x413   :  { %849 = vmatpush1.bf16.msra.mxu0 %v1151_v40  ;;  %880 = vmatprep.mubr.bf16.mxu0 %v1194_v51 }
 0x414   :  { %850 = vmatprep.subr.bf16.mxu0 %v1159_v43 }
 0x417   :  { %851 = vmatpush1.bf16.msra.mxu0 %v1157_v44 }
 0x418   :  { %852 = vmatprep.subr.bf16.mxu0 %v1165_v45 }
 0x41b   :  { %853 = vmatpush1.bf16.msra.mxu0 %v1163_v46 }
 0x41c   :  { %854 = vmatprep.subr.bf16.mxu0 %v1171_v48 }
 0x41f   :  { %855 = vmatpush1.bf16.msra.mxu0 %v1169_v50 }
 0x4e5   :  { %v678_v53 = vpop.f32.mrb[8].mxu0 }
 0x4e6   :  { %v679_v54 = vadd.f32 %v981_v52, %v678_v53  ;;  %v1099_v55 = vpop.f32.mrb[9].mxu0 }
 0x4e7   :  { %v681_v56 = vpop.f32.mrb[10].mxu0 }
 0x4e8   :  { %v684_v57 = vmax.f32 %v679_v54, 0.0  ;;  %v1100_v58 = vpop.f32.mrb[11].mxu0 }
 0x4ea   :  { %v685_v59 = vpack.c.bf16 %v684_v57, %v684_v57 }
 0x4ec   :  { %1001 = vmatmul.mubr.msk.bf16.vlgmr.msra.gmra.mrb[12].mxu1 %vm427_vm1, %v685_v59  ;;  %1002 = vmatmul.mubr.msk.bf16.vlgmr.msra.gmra.mrb[12].mxu0 %vm427_vm1, %v685_v59 }
 0x5bf   :  { %v841_v7 = vpop.f32.mrb[12].mxu1  ;;  %v882_v8 = vpop.f32.mrb[12].mxu0 }
 0x5c0   :  { %v842_v9 = vadd.f32 %v841_v7, %v707_v3  ;;  %v883_v10 = vadd.f32 %v882_v8, %v715_v4  ;;  %v843_v11 = vpop.f32.mrb[13].mxu1  ;;  %v884_v12 = vpop.f32.mrb[13].mxu0 }
 0x5c1   :  { %v844_v13 = vadd.f32 %v843_v11, %v711_v5  ;;  %v885_v14 = vadd.f32 %v884_v12, %v719_v6  ;;  %v845_v15 = vpop.f32.mrb[14].mxu1  ;;  %v886_v16 = vpop.f32.mrb[14].mxu0 }
 0x5c2   :  { %v1003_v17 = vmul.f32 -1.442695, %v842_v9  ;;  %v1005_v18 = vmul.f32 -1.442695, %v883_v10  ;;  %v846_v19 = vpop.f32.mrb[15].mxu1  ;;  %v887_v20 = vpop.f32.mrb[15].mxu0 }
 0x5c3   :  { %v1004_v21 = vmul.f32 -1.442695, %v844_v13  ;;  %v1006_v22 = vmul.f32 -1.442695, %v885_v14 }
 0x5c4   :  { %1174 = vpow2.f32 %v1003_v17 }
 0x5c5   :  { %1176 = vpow2.f32 %v1005_v18 }
 0x5c6   :  { %1178 = vpow2.f32 %v1004_v21 }
 0x5c7   :  { %1180 = vpow2.f32 %v1006_v22 }
 0x5ce   :  { %v1175_v23 = vpop.eup %1174 }
 0x5cf   :  { %v1177_v24 = vpop.eup %1176  ;;  %v901_v25 = vadd.f32 1.0, %v1175_v23 }
 0x5d0   :  { %v1179_v26 = vpop.eup %1178  ;;  %v903_v27 = vadd.f32 1.0, %v1177_v24 }
 0x5d1   :  { %v1181_v28 = vpop.eup %1180  ;;  %1182 = vrcp.f32 %v901_v25  ;;  %v902_v29 = vadd.f32 1.0, %v1179_v26 }
 0x5d2   :  { %1184 = vrcp.f32 %v903_v27  ;;  %v904_v30 = vadd.f32 1.0, %v1181_v28 }
 0x5d3   :  { %1186 = vrcp.f32 %v902_v29 }
 0x5d4   :  { %1188 = vrcp.f32 %v904_v30 }
 0x5db   :  { %v1183_v31 = vpop.eup %1182 }
 0x5dc   :  { %v1185_v32 = vpop.eup %1184  ;;  %913 = vst [vmem:[%s1508_s9] sm:$0xff] %v1183_v31 }
 0x5dd   :  { %v1187_v33 = vpop.eup %1186  ;;  %915 = vst [vmem:[%s1508_s9 + $0x10] sm:$0xff] %v1185_v32 }
 0x5de   :  { %v1189_v34 = vpop.eup %1188  ;;  %914 = vst [vmem:[%s1508_s9 + $0x8] sm:$0xff] %v1187_v33 }
 0x5df   :  { %916 = vst [vmem:[%s1508_s9 + $0x18] sm:$0xff] %v1189_v34 }

</bundles_post_ra>
